<compile_context>
chip_gen: v7x
topology: tpu7x:2x2x1
jax: 0.10.0
libtpu: 0.0.40
codegen_flags: <defaults>
</compile_context>

<pallas_src>
import jax
import jax.numpy as jnp
from jax.experimental import pallas as pl
from jax.experimental.pallas import tpu as pltpu


# --------------------------------------------------------------------------
# kernel
# --------------------------------------------------------------------------
def _attn_triplet_kernel(x1_ref, x2_ref, x3_ref, w_ref, u_ref,
                         out_ref, alpha_ref):
    w = w_ref[...]                                  # (D, H), resident
    u_row = u_ref[...].astype(jnp.float32)          # (1, H), resident

    x1 = x1_ref[...]                                # (tn, D)
    x2 = x2_ref[...]
    x3 = x3_ref[...]

    # bf16-native EUP on v6e/v7x: run tanh in bf16 when inputs are bf16,
    # otherwise keep full f32.
    act_dtype = jnp.bfloat16 if x1.dtype == jnp.bfloat16 else jnp.float32

    def score(x):
        # (tn, D) @ (D, H) on the MXU with an f32 accumulator; the (H,1)
        # u-projection is a VPU multiply + lane reduce (no 1-lane-wide MXU).
        acc = jnp.dot(x, w, preferred_element_type=jnp.float32)     # (tn, H)
        v = jnp.tanh(acc.astype(act_dtype)).astype(jnp.float32)
        return jnp.sum(v * u_row, axis=-1, keepdims=True)           # (tn, 1)

    # lane-pack the three modality scores into one (tn, 3) tile.
    s = jnp.concatenate([score(x1), score(x2), score(x3)], axis=-1) + 1e-6

    # numerically stable 3-way softmax on the packed tile.
    m = jnp.max(s, axis=-1, keepdims=True)
    e = jnp.exp(s - m)                                              # (tn, 3)
    d = jnp.sum(e, axis=-1, keepdims=True)                          # (tn, 1)
    r = pl.reciprocal(d, approx=True)
    r = r * (2.0 - d * r)            # one Newton step: ~f32 accuracy, VPU-only
    alpha = e * r                                                   # (tn, 3)

    alpha_ref[...] = alpha.astype(alpha_ref.dtype)

    # weighted combination of the three embeddings (f32 accumulation).
    out = (alpha[:, 0:1] * x1.astype(jnp.float32)
           + alpha[:, 1:2] * x2.astype(jnp.float32)
           + alpha[:, 2:3] * x3.astype(jnp.float32))
    out_ref[...] = out.astype(out_ref.dtype)


# --------------------------------------------------------------------------
# tiling helpers
# --------------------------------------------------------------------------
def _cdiv(a, b):
    return (a + b - 1) // b


def _round_up(x, m):
    return ((x + m - 1) // m) * m


def _vmem_capacity_bytes():
    try:
        info = pltpu.get_tpu_info()
        cap = getattr(info, "vmem_capacity_bytes", None)
        if cap:
            return int(cap)
    except Exception:
        pass
    return 64 * 1024 * 1024   # conservative default (v7x per-TC VMEM)


def _choose_row_tile(N, D, H, itemsize, num_tc=2):
    """Row tile sized from block bytes against the generation's VMEM."""
    vmem = _vmem_capacity_bytes()
    budget = vmem // 2                          # pipeline buffers get ~half of VMEM
    weight_bytes = 2 * (D * H + H) * 4          # W + u, double-buffered
    # 3 input + 1 output streams, double-buffered, plus f32 in-kernel
    # intermediates (combine temp ~2D, v ~3H, scores/alpha ~8) per row.
    per_row = 2 * 4 * D * itemsize + (2 * D + 3 * H + 8) * 4
    tn = (budget - weight_bytes) // max(per_row, 1)
    # cap a single input block at ~8 MiB so one step never gets absurdly big.
    tn = min(tn, (8 << 20) // max(D * itemsize, 1))
    tn = max(tn, 8)
    if tn >= 512:
        tn = (tn // 256) * 256
    else:
        tn = max(8, (tn // 8) * 8)
    # never exceed the (sublane-padded) problem size.
    tn = min(tn, _round_up(N, 8))
    # ensure >= 2 steps per TensorCore on non-trivial problems (v7x has 2 TCs),
    # which also gives the double-buffer pipeline something to overlap.
    if N >= 256:
        min_steps = 2 * num_tc
        if _cdiv(N, tn) < min_steps:
            tn = max(8, _round_up(_cdiv(N, min_steps), 8))
    return int(max(tn, 8))


def _squeeze_embed(x):
    # torch.squeeze() drops all size-1 dims; the module only sees (N, D) or
    # (N, 1, D), so only drop the middle axis (keeps N==1 batches intact).
    if x.ndim == 3 and x.shape[1] == 1:
        return x[:, 0, :]
    if x.ndim == 2:
        return x
    return jnp.squeeze(x)


# --------------------------------------------------------------------------
# wrapper
# --------------------------------------------------------------------------
def attention_layer_triplet(x1, x2, x3, w_omega, u_omega, *, tn=None):
    """x1/x2/x3: (N, in_feat) [or (N,1,in_feat)]; w_omega: (D, H); u_omega: (H, 1)."""
    x1 = _squeeze_embed(x1)
    x2 = _squeeze_embed(x2)
    x3 = _squeeze_embed(x3)

    N, D = x1.shape
    H = w_omega.shape[1]
    u_row = jnp.reshape(u_omega, (1, H))            # lane-major row of u

    itemsize = jnp.dtype(x1.dtype).itemsize
    w_itemsize = jnp.dtype(w_omega.dtype).itemsize
    if tn is None:
        tn = _choose_row_tile(N, D, H, itemsize)

    grid = (_cdiv(N, tn),)

    # vmem limit from actual need (+25% headroom), not a fraction of physical.
    block_bytes = 2 * (3 * tn * D * itemsize + tn * D * itemsize + tn * 3 * 4)
    weight_bytes = 2 * (D * H + H) * w_itemsize
    interm_bytes = tn * (3 * D + 3 * H + 32) * 4
    vmem_limit = int((block_bytes + weight_bytes + interm_bytes) * 1.25) + (2 << 20)
    vmem_limit = max(vmem_limit, 16 << 20)
    vmem_limit = min(vmem_limit, _vmem_capacity_bytes())

    cost = pl.CostEstimate(
        flops=int(6 * N * D * H + 6 * N * H + 10 * N * D + 24 * N),
        transcendentals=int(3 * N * H + 4 * N),
        bytes_accessed=int(4 * N * D * itemsize + (D * H + H) * w_itemsize + 3 * N * 4),
    )

    out_combined, alpha = pl.pallas_call(
        _attn_triplet_kernel,
        out_shape=(
            jax.ShapeDtypeStruct((N, D), x1.dtype),
            jax.ShapeDtypeStruct((N, 3), jnp.float32),
        ),
        grid_spec=pltpu.PrefetchScalarGridSpec(
            num_scalar_prefetch=0,
            grid=grid,
            in_specs=[
                pl.BlockSpec((tn, D), lambda i: (i, 0)),
                pl.BlockSpec((tn, D), lambda i: (i, 0)),
                pl.BlockSpec((tn, D), lambda i: (i, 0)),
                pl.BlockSpec((D, H), lambda i: (0, 0)),   # resident weights
                pl.BlockSpec((1, H), lambda i: (0, 0)),   # resident u row
            ],
            out_specs=[
                pl.BlockSpec((tn, D), lambda i: (i, 0)),
                pl.BlockSpec((tn, 3), lambda i: (i, 0)),
            ],
        ),
        compiler_params=pltpu.CompilerParams(
            dimension_semantics=("parallel",),
            vmem_limit_bytes=int(vmem_limit),
        ),
        cost_estimate=cost,
    )(x1, x2, x3, w_omega, u_row)
    return out_combined, alpha


# --------------------------------------------------------------------------
# reference + demo
# --------------------------------------------------------------------------
def _xavier_uniform(key, shape, dtype=jnp.float32):
    fan_in, fan_out = shape[0], shape[1]
    limit = (6.0 / (fan_in + fan_out)) ** 0.5
    return jax.random.uniform(key, shape, dtype, minval=-limit, maxval=limit)


def _reference(x1, x2, x3, w, u):
    x1 = x1.astype(jnp.float32)
    x2 = x2.astype(jnp.float32)
    x3 = x3.astype(jnp.float32)
    w = w.astype(jnp.float32)
    u = u.astype(jnp.float32)
    emb = jnp.stack([x1, x2, x3], axis=1)                        # (N,3,D)
    v = jnp.tanh(jnp.einsum('nmd,dh->nmh', emb, w))
    vu = jnp.einsum('nmh,ho->nmo', v, u)[..., 0]                 # (N,3)
    alpha = jax.nn.softmax(vu + 1e-6, axis=1)
    out = jnp.einsum('nmd,nm->nd', emb, alpha)
    return out, alpha


if __name__ == "__main__":
    key = jax.random.PRNGKey(0)
    ok = True
    # cases: divisible N; non-divisible N with D % 128 != 0; bf16 I/O path.
    cases = [
        (64, 128, 32, jnp.float32, 1e-4),
        (50, 96, 40, jnp.float32, 1e-4),
        (512, 128, 32, jnp.bfloat16, 3e-2),
    ]
    for (N, D, H, dtype, tol) in cases:
        k1, k2, k3, kw, ku = jax.random.split(jax.random.fold_in(key, N), 5)
        x1 = jax.random.normal(k1, (N, 1, D), jnp.float32).astype(dtype)  # squeeze path
        x2 = jax.random.normal(k2, (N, D), jnp.float32).astype(dtype)
        x3 = jax.random.normal(k3, (N, D), jnp.float32).astype(dtype)
        w_omega = _xavier_uniform(kw, (D, H)).astype(dtype)
        u_omega = _xavier_uniform(ku, (H, 1))

        out, alpha = attention_layer_triplet(x1, x2, x3, w_omega, u_omega)
        out = jax.block_until_ready(out)
        alpha = jax.block_until_ready(alpha)

        ref_out, ref_alpha = _reference(x1[:, 0, :], x2, x3, w_omega, u_omega)
        ok &= bool(jnp.allclose(out.astype(jnp.float32), ref_out, atol=tol, rtol=tol))
        ok &= bool(jnp.allclose(alpha, ref_alpha, atol=tol, rtol=tol))

    assert ok, "Pallas kernel does not match reference"
    print("KERNEL_OK")
</pallas_src>

<mosaic_0001>
module attributes {stable_mosaic.version = 11 : i64} {
  func.func @_attn_triplet_kernel(%arg0: i32, %arg1: memref<64x128xf32, #tpu.memory_space<vmem>>, %arg2: memref<64x128xf32, #tpu.memory_space<vmem>>, %arg3: memref<64x128xf32, #tpu.memory_space<vmem>>, %arg4: memref<128x32xf32, #tpu.memory_space<vmem>>, %arg5: memref<1x32xf32, #tpu.memory_space<vmem>>, %arg6: memref<64x128xf32, #tpu.memory_space<vmem>>, %arg7: memref<64x3xf32, #tpu.memory_space<vmem>>) attributes {dimension_semantics = [#tpu.dimension_semantics<parallel>], iteration_bounds = array<i64: 1>, scalar_prefetch = 0 : i64, scratch_operands = 0 : i64, tpu.core_type = #tpu.core_type<tc>, window_params = [{transform_indices = @transform_0, window_bounds = array<i64: 64, 128>}, {transform_indices = @transform_1, window_bounds = array<i64: 64, 128>}, {transform_indices = @transform_2, window_bounds = array<i64: 64, 128>}, {pipeline_mode = #tpu.pipeline_mode<synchronous>, transform_indices = @transform_3, window_bounds = array<i64: 128, 32>}, {pipeline_mode = #tpu.pipeline_mode<synchronous>, transform_indices = @transform_4, window_bounds = array<i64: 1, 32>}, {transform_indices = @transform_5, window_bounds = array<i64: 64, 128>}, {transform_indices = @transform_6, window_bounds = array<i64: 64, 3>}]} {
    %c0 = arith.constant 0 : index
    %c0_0 = arith.constant 0 : index
    %0 = vector.load %arg4[%c0, %c0_0] : memref<128x32xf32, #tpu.memory_space<vmem>>, vector<128x32xf32>
    %c0_1 = arith.constant 0 : index
    %c0_2 = arith.constant 0 : index
    %1 = vector.load %arg5[%c0_1, %c0_2] : memref<1x32xf32, #tpu.memory_space<vmem>>, vector<1x32xf32>
    %c0_3 = arith.constant 0 : index
    %c0_4 = arith.constant 0 : index
    %2 = vector.load %arg1[%c0_3, %c0_4] : memref<64x128xf32, #tpu.memory_space<vmem>>, vector<64x128xf32>
    %c0_5 = arith.constant 0 : index
    %c0_6 = arith.constant 0 : index
    %3 = vector.load %arg2[%c0_5, %c0_6] : memref<64x128xf32, #tpu.memory_space<vmem>>, vector<64x128xf32>
    %c0_7 = arith.constant 0 : index
    %c0_8 = arith.constant 0 : index
    %4 = vector.load %arg3[%c0_7, %c0_8] : memref<64x128xf32, #tpu.memory_space<vmem>>, vector<64x128xf32>
    %cst = arith.constant dense<0.000000e+00> : vector<64x32xf32>
    %5 = tpu.matmul %2, %0, %cst {dimension_numbers = #tpu.dot_dimension_numbers<[1], [0], [0], [1], [0, 0, 1, 1], [], []>} : vector<64x128xf32>, vector<128x32xf32>, vector<64x32xf32> -> vector<64x32xf32>
    %6 = math.tanh %5 : vector<64x32xf32>
    %7 = vector.broadcast %1 : vector<1x32xf32> to vector<64x32xf32>
    %8 = arith.mulf %6, %7 : vector<64x32xf32>
    %cst_9 = arith.constant dense<0.000000e+00> : vector<64xf32>
    %9 = vector.multi_reduction <add>, %8, %cst_9 [1] : vector<64x32xf32> to vector<64xf32>
    %10 = vector.shape_cast %9 : vector<64xf32> to vector<64x1xf32>
    %cst_10 = arith.constant dense<0.000000e+00> : vector<64x32xf32>
    %11 = tpu.matmul %3, %0, %cst_10 {dimension_numbers = #tpu.dot_dimension_numbers<[1], [0], [0], [1], [0, 0, 1, 1], [], []>} : vector<64x128xf32>, vector<128x32xf32>, vector<64x32xf32> -> vector<64x32xf32>
    %12 = math.tanh %11 : vector<64x32xf32>
    %13 = vector.broadcast %1 : vector<1x32xf32> to vector<64x32xf32>
    %14 = arith.mulf %12, %13 : vector<64x32xf32>
    %cst_11 = arith.constant dense<0.000000e+00> : vector<64xf32>
    %15 = vector.multi_reduction <add>, %14, %cst_11 [1] : vector<64x32xf32> to vector<64xf32>
    %16 = vector.shape_cast %15 : vector<64xf32> to vector<64x1xf32>
    %cst_12 = arith.constant dense<0.000000e+00> : vector<64x32xf32>
    %17 = tpu.matmul %4, %0, %cst_12 {dimension_numbers = #tpu.dot_dimension_numbers<[1], [0], [0], [1], [0, 0, 1, 1], [], []>} : vector<64x128xf32>, vector<128x32xf32>, vector<64x32xf32> -> vector<64x32xf32>
    %18 = math.tanh %17 : vector<64x32xf32>
    %19 = vector.broadcast %1 : vector<1x32xf32> to vector<64x32xf32>
    %20 = arith.mulf %18, %19 : vector<64x32xf32>
    %cst_13 = arith.constant dense<0.000000e+00> : vector<64xf32>
    %21 = vector.multi_reduction <add>, %20, %cst_13 [1] : vector<64x32xf32> to vector<64xf32>
    %22 = vector.shape_cast %21 : vector<64xf32> to vector<64x1xf32>
    %23 = tpu.concatenate %10, %16, %22 in 1 : vector<64x1xf32>, vector<64x1xf32>, vector<64x1xf32> -> vector<64x3xf32>
    %cst_14 = arith.constant 9.99999997E-7 : f32
    %24 = vector.broadcast %cst_14 : f32 to vector<64x3xf32>
    %25 = arith.addf %23, %24 : vector<64x3xf32>
    %cst_15 = arith.constant dense<0xFF800000> : vector<64xf32>
    %26 = vector.multi_reduction <maximumf>, %25, %cst_15 [1] : vector<64x3xf32> to vector<64xf32>
    %27 = vector.shape_cast %26 : vector<64xf32> to vector<64x1xf32>
    %28 = vector.broadcast %27 : vector<64x1xf32> to vector<64x3xf32>
    %29 = arith.subf %25, %28 : vector<64x3xf32>
    %30 = math.exp %29 : vector<64x3xf32>
    %cst_16 = arith.constant dense<0.000000e+00> : vector<64xf32>
    %31 = vector.multi_reduction <add>, %30, %cst_16 [1] : vector<64x3xf32> to vector<64xf32>
    %32 = vector.shape_cast %31 : vector<64xf32> to vector<64x1xf32>
    %33 = tpu.reciprocal %32 {approx = true} : vector<64x1xf32> -> vector<64x1xf32>
    %34 = arith.mulf %32, %33 : vector<64x1xf32>
    %cst_17 = arith.constant 2.000000e+00 : f32
    %35 = vector.broadcast %cst_17 : f32 to vector<64x1xf32>
    %36 = arith.subf %35, %34 : vector<64x1xf32>
    %37 = arith.mulf %33, %36 : vector<64x1xf32>
    %38 = vector.broadcast %37 : vector<64x1xf32> to vector<64x3xf32>
    %39 = arith.mulf %30, %38 : vector<64x3xf32>
    %c0_18 = arith.constant 0 : index
    %c0_19 = arith.constant 0 : index
    %40 = vector.load %arg7[%c0_18, %c0_19] : memref<64x3xf32, #tpu.memory_space<vmem>>, vector<64x3xf32>
    tpu.vector_store %arg7[%c0_18, %c0_19], %39 {strides = array<i32>} : memref<64x3xf32, #tpu.memory_space<vmem>>, vector<64x3xf32>,
    %41 = vector.extract_strided_slice %39 {offsets = [0, 0], sizes = [64, 1], strides = [1, 1]} : vector<64x3xf32> to vector<64x1xf32>
    %42 = vector.broadcast %41 : vector<64x1xf32> to vector<64x128xf32>
    %43 = arith.mulf %42, %2 : vector<64x128xf32>
    %44 = vector.extract_strided_slice %39 {offsets = [0, 1], sizes = [64, 1], strides = [1, 1]} : vector<64x3xf32> to vector<64x1xf32>
    %45 = vector.broadcast %44 : vector<64x1xf32> to vector<64x128xf32>
    %46 = arith.mulf %45, %3 : vector<64x128xf32>
    %47 = arith.addf %43, %46 : vector<64x128xf32>
    %48 = vector.extract_strided_slice %39 {offsets = [0, 2], sizes = [64, 1], strides = [1, 1]} : vector<64x3xf32> to vector<64x1xf32>
    %49 = vector.broadcast %48 : vector<64x1xf32> to vector<64x128xf32>
    %50 = arith.mulf %49, %4 : vector<64x128xf32>
    %51 = arith.addf %47, %50 : vector<64x128xf32>
    %c0_20 = arith.constant 0 : index
    %c0_21 = arith.constant 0 : index
    %52 = vector.load %arg6[%c0_20, %c0_21] : memref<64x128xf32, #tpu.memory_space<vmem>>, vector<64x128xf32>
    tpu.vector_store %arg6[%c0_20, %c0_21], %51 {strides = array<i32>} : memref<64x128xf32, #tpu.memory_space<vmem>>, vector<64x128xf32>,
    return
  }
  func.func @transform_0(%arg0: i32) -> (i32, i32) {
    %c0_i32 = arith.constant 0 : i32
    %c0_i32_0 = arith.constant 0 : i32
    return %arg0, %c0_i32 : i32, i32
  }
  func.func @transform_1(%arg0: i32) -> (i32, i32) {
    %c0_i32 = arith.constant 0 : i32
    %c0_i32_0 = arith.constant 0 : i32
    return %arg0, %c0_i32 : i32, i32
  }
  func.func @transform_2(%arg0: i32) -> (i32, i32) {
    %c0_i32 = arith.constant 0 : i32
    %c0_i32_0 = arith.constant 0 : i32
    return %arg0, %c0_i32 : i32, i32
  }
  func.func @transform_3(%arg0: i32) -> (i32, i32) {
    %c0_i32 = arith.constant 0 : i32
    %c0_i32_0 = arith.constant 0 : i32
    %c0_i32_1 = arith.constant 0 : i32
    return %c0_i32, %c0_i32_0 : i32, i32
  }
  func.func @transform_4(%arg0: i32) -> (i32, i32) {
    %c0_i32 = arith.constant 0 : i32
    %c0_i32_0 = arith.constant 0 : i32
    %c0_i32_1 = arith.constant 0 : i32
    return %c0_i32, %c0_i32_0 : i32, i32
  }
  func.func @transform_5(%arg0: i32) -> (i32, i32) {
    %c0_i32 = arith.constant 0 : i32
    %c0_i32_0 = arith.constant 0 : i32
    return %arg0, %c0_i32 : i32, i32
  }
  func.func @transform_6(%arg0: i32) -> (i32, i32) {
    %c0_i32 = arith.constant 0 : i32
    %c0_i32_0 = arith.constant 0 : i32
    return %arg0, %c0_i32 : i32, i32
  }
}

</mosaic_0001>

<bundles_post_ra>
// kernel: tpu_custom_call.1
= control target key start
LH: loop header
LB: loop body
LE: loop exit
PB: predicated region body
PF: predicated region fallthrough
CT: control target
= control target key end

     0   :  { %12 = vsyncpa [#allocation3], 0  ;;  %s1807_s0 = inlined_call_operand.vmem [shape: f32[64,128], index: 0, kind: input, shape index: {}]   ;;  %s1808_s1 = inlined_call_operand.vmem [shape: f32[64,128], index: 1, kind: input, shape index: {}]   ;;  %s1809_s2 = inlined_call_operand.hbm [shape: f32[64,128], index: 2, kind: input, shape index: {}]   ;;  %s1810_s3 = inlined_call_operand.vmem [shape: f32[128,32], index: 3, kind: input, shape index: {}]   ;;  %s1811_s4 = inlined_call_operand.vmem [shape: f32[1,32], index: 4, kind: input, shape index: {}]   ;;  %s1812_s5 = inlined_call_operand.hbm [shape: f32[64,128], index: 5, kind: output, shape index: {0}]   ;;  %s1813_s6 = inlined_call_operand.vmem [shape: f32[64,3], index: 6, kind: output, shape index: {1}]  }
   0x1   :  { %13 = vsyncpa [#allocation4], 0  ;;  %s1312_s21 = smov [#allocation2]   ;;  %s1264_s25 = scalar_lea.hbm %s1809_s2, 1024 }
   0x2   :  { %s23_s22 = sshll.u32 %s1312_s21, 4  ;;  %p1265_p0 = scmp.ne.s32.totalorder %s1809_s2, %s1264_s25  ;;  %s24_s22 = int_to_ptr.vmem [resolvable:$true] %s23_s22 }
   0x3   :  { %p1268_p1 = scmp.lt.u32.totalorder %s1264_s25, %s1809_s2 }
   0x5   :  { %p1270_p2 = pnand %p1268_p1, %p1265_p0 }
   0x7   :  { %1273 = shalt.err (!%p1270_p2)
}
   0x8   :  { %s1274_s30 = scalar_lea.vmem %s24_s22, 1024  ;;  %p1279_p4 = scmp.lt.s32.totalorder %s24_s22, %s24_s22 }
   0x9   :  { %p1275_p3 = scmp.ne.s32.totalorder %s24_s22, %s1274_s30  ;;  %p1280_p5 = scmp.lt.s32.totalorder %s1274_s30, %s1274_s30 }
   0xb   :  { %p1281_p6 = por %p1280_p5, %p1279_p4 }
   0xd   :  { %p1282_p7 = pnand %p1281_p6, %p1275_p3 }
   0xf   :  { %1285 = shalt.err (!%p1282_p7)
}
  0x10   :  { %s1313_s7 = smov 128   ;;  %s1314_s8 = smov 8  }
  0x11   :  { %29 = dma.hbm_to_vmem [thread:$0]  %s1809_s2, 1024, %s24_s22, [#allocation3], %s1313_s7, %s1313_s7, %s1314_s8  }
  0x12   :  { %1308 = dma.done.wait [#allocation3], 1024  }
  0x13   :  { %1309 = vsyncadd [#allocation3], 4294966272  ;;  %v37_v0 = vld [vmem:[%s1810_s3] sm:$0xff]  ;;  %v38_v1 = vld [vmem:[%s1810_s3 + $0x8] sm:$0xff]  ;;  %vm205_vm0 = vcmask 261120   ;;  %vm520_vm1 = vcmask 7168  }
  0x14   :  { %v39_v2 = vld [vmem:[%s1810_s3 + $0x10] sm:$0xff]  ;;  %v1378_v3 = vpack.c.bf16 %v38_v1, %v37_v0  ;;  %v40_v4 = vld [vmem:[%s1810_s3 + $0x18] sm:$0xff]  ;;  %v41_v6 = vld [vmem:[%s1810_s3 + $0x20] sm:$0xff]  ;;  %vm529_vm2 = vcmask 15360   ;;  %vm546_vm3 = vcmask 23552  }
  0x15   :  { %v1383_v5 = vpack.c.bf16 %v40_v4, %v39_v2  ;;  %v42_v7 = vld [vmem:[%s1810_s3 + $0x28] sm:$0xff]  ;;  %v54_v9 = vld [vmem:[%s1807_s0] sm:$0xff]  ;;  %v43_v11 = vld [vmem:[%s1810_s3 + $0x30] sm:$0xff] }
  0x16   :  { %1046 = vmatprep.subr.bf16.mxu0 %v1378_v3  ;;  %1078 = vmatprep.subr.bf16.mxu1 %v1378_v3  ;;  %v1397_v8 = vpack.c.bf16 %v42_v7, %v41_v6  ;;  %v62_v10 = vld [vmem:[%s1808_s1] sm:$0xff]  ;;  %v44_v12 = vld [vmem:[%s1810_s3 + $0x38] sm:$0xff]  ;;  %v46_v15 = vld [vmem:[%s1810_s3 + $0x48] sm:$0xff] }
  0x17   :  { %1048 = vmatpush3.bf16.msra.mxu0 %v1378_v3  ;;  %1080 = vmatpush3.bf16.msra.mxu1 %v1378_v3  ;;  %v1415_v13 = vpack.c.bf16 %v44_v12, %v43_v11  ;;  %v45_v14 = vld [vmem:[%s1810_s3 + $0x40] sm:$0xff]  ;;  %v47_v17 = vld [vmem:[%s1810_s3 + $0x50] sm:$0xff]  ;;  %v48_v18 = vld [vmem:[%s1810_s3 + $0x58] sm:$0xff] }
  0x18   :  { %1050 = vmatprep.subr.bf16.mxu0 %v1383_v5  ;;  %1082 = vmatprep.subr.bf16.mxu1 %v1383_v5  ;;  %v1427_v16 = vpack.c.bf16 %v46_v15, %v45_v14  ;;  %v1439_v19 = vpack.c.bf16 %v48_v18, %v47_v17  ;;  %v49_v20 = vld [vmem:[%s1810_s3 + $0x60] sm:$0xff]  ;;  %v50_v21 = vld [vmem:[%s1810_s3 + $0x68] sm:$0xff]  ;;  %v51_v23 = vld [vmem:[%s1810_s3 + $0x70] sm:$0xff] }
  0x19   :  { %945 = vmatprep.mubr.f32.mxu0 %v54_v9  ;;  %989 = vmatprep.mubr.f32.mxu1 %v62_v10  ;;  %v1451_v22 = vpack.c.bf16 %v50_v21, %v49_v20  ;;  %v52_v24 = vld [vmem:[%s1810_s3 + $0x78] sm:$0xff]  ;;  %v1474_v26 = vld [vmem:[%s1807_s0 + $0x8] sm:$0xff]  ;;  %v1485_v28 = vld [vmem:[%s1807_s0 + $0x10] sm:$0xff] }
  0x1a   :  { %v1463_v25 = vpack.c.bf16 %v52_v24, %v51_v23  ;;  %v1479_v27 = vld [vmem:[%s1808_s1 + $0x8] sm:$0xff]  ;;  %v1493_v29 = vld [vmem:[%s1808_s1 + $0x10] sm:$0xff]  ;;  %v1500_v30 = vld [vmem:[%s1807_s0 + $0x18] sm:$0xff] }
  0x1b   :  { %1052 = vmatpush3.bf16.msra.mxu0 %v1383_v5  ;;  %1084 = vmatpush3.bf16.msra.mxu1 %v1383_v5  ;;  %v1505_v31 = vld [vmem:[%s1808_s1 + $0x18] sm:$0xff]  ;;  %v1512_v32 = vld [vmem:[%s1807_s0 + $0x20] sm:$0xff]  ;;  %v1528_v34 = vld [vmem:[%s1807_s0 + $0x28] sm:$0xff] }
  0x1c   :  { %1054 = vmatprep.subr.bf16.mxu0 %v1397_v8  ;;  %1086 = vmatprep.subr.bf16.mxu1 %v1397_v8  ;;  %v1521_v33 = vld [vmem:[%s1808_s1 + $0x20] sm:$0xff]  ;;  %v1533_v35 = vld [vmem:[%s1808_s1 + $0x28] sm:$0xff]  ;;  %v1540_v36 = vld [vmem:[%s1807_s0 + $0x30] sm:$0xff] }
  0x1d   :  { %v1549_v37 = vld [vmem:[%s1808_s1 + $0x30] sm:$0xff]  ;;  %v1556_v38 = vld [vmem:[%s1807_s0 + $0x38] sm:$0xff]  ;;  %v1565_v40 = vld [vmem:[#allocation2] sm:$0xff] }
  0x1e   :  { %v1561_v39 = vld [vmem:[%s1808_s1 + $0x38] sm:$0xff]  ;;  %v1571_v41 = vld [vmem:[#allocation2 + $0x20] sm:$0xff]  ;;  %v1592_v42 = vld [vmem:[#allocation2 + $0x8] sm:$0xff] }
  0x1f   :  { %1056 = vmatpush3.bf16.msra.mxu0 %v1397_v8  ;;  %1088 = vmatpush3.bf16.msra.mxu1 %v1397_v8  ;;  %v1595_v43 = vld [vmem:[#allocation2 + $0x28] sm:$0xff]  ;;  %v1597_v44 = vld [vmem:[#allocation2 + $0x10] sm:$0xff]  ;;  %v1604_v46 = vld [vmem:[#allocation2 + $0x18] sm:$0xff] }
  0x20   :  { %1058 = vmatprep.subr.bf16.mxu0 %v1415_v13  ;;  %1090 = vmatprep.subr.bf16.mxu1 %v1415_v13  ;;  %v1599_v45 = vld [vmem:[#allocation2 + $0x30] sm:$0xff]  ;;  %v1607_v47 = vld [vmem:[#allocation2 + $0x38] sm:$0xff]  ;;  %v1614_v58 = vld [vmem:[%s1811_s4] ss:$0 sm:$0xff] }
  0x23   :  { %1060 = vmatpush3.bf16.msra.mxu0 %v1415_v13  ;;  %1092 = vmatpush3.bf16.msra.mxu1 %v1415_v13 }
  0x24   :  { %1062 = vmatprep.subr.bf16.mxu0 %v1427_v16  ;;  %1094 = vmatprep.subr.bf16.mxu1 %v1427_v16 }
  0x27   :  { %1064 = vmatpush3.bf16.msra.mxu0 %v1427_v16  ;;  %1096 = vmatpush3.bf16.msra.mxu1 %v1427_v16 }
  0x28   :  { %1066 = vmatprep.subr.bf16.mxu0 %v1439_v19  ;;  %1098 = vmatprep.subr.bf16.mxu1 %v1439_v19 }
  0x2b   :  { %1068 = vmatpush3.bf16.msra.mxu0 %v1439_v19  ;;  %1100 = vmatpush3.bf16.msra.mxu1 %v1439_v19 }
  0x2c   :  { %1070 = vmatprep.subr.bf16.mxu0 %v1451_v22  ;;  %1102 = vmatprep.subr.bf16.mxu1 %v1451_v22 }
  0x2f   :  { %1072 = vmatpush3.bf16.msra.mxu0 %v1451_v22  ;;  %1104 = vmatpush3.bf16.msra.mxu1 %v1451_v22 }
  0x30   :  { %1074 = vmatprep.subr.bf16.mxu0 %v1463_v25  ;;  %1106 = vmatprep.subr.bf16.mxu1 %v1463_v25 }
  0x33   :  { %1076 = vmatpush3.bf16.msra.mxu0 %v1463_v25  ;;  %1108 = vmatpush3.bf16.msra.mxu1 %v1463_v25 }
  0x34   :  { %1110 = vmatprep.subr.bf16.mxu0 %v1378_v3  ;;  %1141 = vmatprep.subr.bf16.mxu1 %v1378_v3 }
  0x36   :  { %946 = vmatmul.mubr.f32.vlgmr.msra.gmra.mrb[0].mxu0 %v1474_v26  ;;  %990 = vmatmul.mubr.f32.vlgmr.msra.gmra.mrb[0].mxu1 %v1479_v27 }
  0x37   :  { %1112 = vmatpush3.bf16.msra.mxu0 %v1378_v3  ;;  %948 = vmatprep.mubr.f32.mxu0 %v1485_v28 }
  0x38   :  { %1149 = vmatpush3.bf16.msra.mxu1 %v1378_v3  ;;  %1114 = vmatprep.subr.bf16.mxu0 %v1383_v5 }
  0x39   :  { %992 = vmatprep.mubr.f32.mxu1 %v1493_v29  ;;  %1142 = vmatprep.subr.bf16.mxu1 %v1383_v5 }
  0x3a   :  { %949 = vmatmul.mubr.f32.gmra.mrb[2].mxu0 %v1500_v30  ;;  %993 = vmatmul.mubr.f32.gmra.mrb[2].mxu1 %v1505_v31 }
  0x3b   :  { %1116 = vmatpush3.bf16.msra.mxu0 %v1383_v5  ;;  %951 = vmatprep.mubr.f32.mxu0 %v1512_v32 }
  0x3c   :  { %1150 = vmatpush3.bf16.msra.mxu1 %v1383_v5  ;;  %1118 = vmatprep.subr.bf16.mxu0 %v1397_v8 }
  0x3d   :  { %1143 = vmatprep.subr.bf16.mxu1 %v1397_v8  ;;  %995 = vmatprep.mubr.f32.mxu1 %v1521_v33 }
  0x3e   :  { %952 = vmatmul.mubr.f32.gmra.mrb[4].mxu0 %v1528_v34  ;;  %996 = vmatmul.mubr.f32.gmra.mrb[4].mxu1 %v1533_v35 }
  0x3f   :  { %1120 = vmatpush3.bf16.msra.mxu0 %v1397_v8  ;;  %954 = vmatprep.mubr.f32.mxu0 %v1540_v36 }
  0x40   :  { %1151 = vmatpush3.bf16.msra.mxu1 %v1397_v8  ;;  %1122 = vmatprep.subr.bf16.mxu0 %v1415_v13 }
  0x41   :  { %1144 = vmatprep.subr.bf16.mxu1 %v1415_v13  ;;  %998 = vmatprep.mubr.f32.mxu1 %v1549_v37 }
  0x42   :  { %955 = vmatmul.mubr.f32.gmra.mrb[6].mxu0 %v1556_v38  ;;  %999 = vmatmul.mubr.f32.gmra.mrb[6].mxu1 %v1561_v39 }
  0x43   :  { %1124 = vmatpush3.bf16.msra.mxu0 %v1415_v13  ;;  %1033 = vmatprep.mubr.f32.mxu0 %v1565_v40 }
  0x44   :  { %1152 = vmatpush3.bf16.msra.mxu1 %v1415_v13  ;;  %1126 = vmatprep.subr.bf16.mxu0 %v1427_v16 }
  0x45   :  { %1145 = vmatprep.subr.bf16.mxu1 %v1427_v16  ;;  %1039 = vmatprep.mubr.f32.mxu1 %v1571_v41 }
  0x47   :  { %1128 = vmatpush3.bf16.msra.mxu0 %v1427_v16 }
  0x48   :  { %1153 = vmatpush3.bf16.msra.mxu1 %v1427_v16  ;;  %1130 = vmatprep.subr.bf16.mxu0 %v1439_v19 }
  0x49   :  { %1146 = vmatprep.subr.bf16.mxu1 %v1439_v19 }
  0x4b   :  { %1132 = vmatpush3.bf16.msra.mxu0 %v1439_v19 }
  0x4c   :  { %1154 = vmatpush3.bf16.msra.mxu1 %v1439_v19  ;;  %1134 = vmatprep.subr.bf16.mxu0 %v1451_v22 }
  0x4d   :  { %1147 = vmatprep.subr.bf16.mxu1 %v1451_v22 }
  0x4f   :  { %1136 = vmatpush3.bf16.msra.mxu0 %v1451_v22 }
  0x50   :  { %1155 = vmatpush3.bf16.msra.mxu1 %v1451_v22  ;;  %1138 = vmatprep.subr.bf16.mxu0 %v1463_v25 }
  0x51   :  { %1148 = vmatprep.subr.bf16.mxu1 %v1463_v25 }
  0x53   :  { %1140 = vmatpush3.bf16.msra.mxu0 %v1463_v25 }
  0x54   :  { %1156 = vmatpush3.bf16.msra.mxu1 %v1463_v25 }
  0x56   :  { %1034 = vmatmul.mubr.f32.vlgmr.msra.gmra.mrb[8].mxu0 %v1592_v42 }
  0x57   :  { %1040 = vmatmul.mubr.f32.vlgmr.msra.gmra.mrb[8].mxu1 %v1595_v43  ;;  %1036 = vmatprep.mubr.f32.mxu0 %v1597_v44 }
  0x58   :  { %1042 = vmatprep.mubr.f32.mxu1 %v1599_v45 }
  0x5a   :  { %1037 = vmatmul.mubr.f32.gmra.mrb[10].mxu0 %v1604_v46 }
  0x5b   :  { %1043 = vmatmul.mubr.f32.gmra.mrb[10].mxu1 %v1607_v47 }
 0x109   :  { %v947_v48 = vpop.f32.mrb[0].mxu0  ;;  %v991_v49 = vpop.f32.mrb[0].mxu1 }
 0x10a   :  { %1182 = vtanh.f32 %v947_v48  ;;  %v144_v50 = vpop.f32.mrb[1].mxu0  ;;  %v296_v51 = vpop.f32.mrb[1].mxu1 }
 0x10b   :  { %1184 = vtanh.f32 %v991_v49 }
 0x10c   :  { %1186 = vtanh.f32 %v144_v50 }
 0x10d   :  { %1188 = vtanh.f32 %v296_v51  ;;  %v950_v52 = vpop.f32.mrb[2].mxu0  ;;  %v994_v53 = vpop.f32.mrb[2].mxu1 }
 0x10e   :  { %1190 = vtanh.f32 %v950_v52  ;;  %v154_v54 = vpop.f32.mrb[3].mxu0  ;;  %v306_v55 = vpop.f32.mrb[3].mxu1 }
 0x10f   :  { %1192 = vtanh.f32 %v994_v53 }
 0x110   :  { %1194 = vtanh.f32 %v306_v55 }
 0x111   :  { %v953_v56 = vpop.f32.mrb[4].mxu0  ;;  %v997_v57 = vpop.f32.mrb[4].mxu1  ;;  %1196 = vtanh.f32 %v154_v54 }
 0x112   :  { %v164_v59 = vpop.f32.mrb[5].mxu0  ;;  %v316_v60 = vpop.f32.mrb[5].mxu1 }
 0x113   :  { %1198 = vtanh.f32 %v164_v59 }
 0x114   :  { %v1183_v61 = vpop.eup %1182  ;;  %1200 = vtanh.f32 %v953_v56 }
 0x115   :  { %v1185_v62 = vpop.eup %1184  ;;  %v198_v63 = vmul.f32 %v1183_v61, %v1614_v58  ;;  %v956_v0 = vpop.f32.mrb[6].mxu0  ;;  %1202 = vtanh.f32 %v316_v60 }
 0x116   :  { %v1000_v1 = vpop.f32.mrb[6].mxu1  ;;  %v1187_v2 = vpop.eup %1186  ;;  %v344_v3 = vmul.f32 %v1185_v62, %v1614_v58  ;;  %1204 = vtanh.f32 %v997_v57 }
 0x117   :  { %v174_v4 = vpop.f32.mrb[7].mxu0  ;;  %v326_v5 = vpop.f32.mrb[7].mxu1  ;;  %v209_v7 = vsel %vm205_vm0, %v198_v63, 0.0  ;;  %v197_v8 = vmul.f32 %v1187_v2, %v1614_v58 }
 0x118   :  { %v1189_v6 = vpop.eup %1188  ;;  %v354_v10 = vsel %vm205_vm0, %v344_v3, 0.0  ;;  %210 = vadd.xlane.f32.xlu0 %v209_v7  ;;  %1206 = vtanh.f32 %v174_v4 }
 0x119   :  { %v1191_v9 = vpop.eup %1190  ;;  %355 = vadd.xlane.f32.xlu1 %v354_v10  ;;  %v206_v13 = vsel %vm205_vm0, %v197_v8, 0.0  ;;  %v343_v15 = vmul.f32 %v1189_v6, %v1614_v58  ;;  %1208 = vtanh.f32 %v956_v0 }
 0x11a   :  { %v200_v11 = vmul.f32 %v1191_v9, %v1614_v58  ;;  %v1193_v12 = vpop.eup %1192  ;;  %1210 = vtanh.f32 %v326_v5 }
 0x11b   :  { %v346_v16 = vmul.f32 %v1193_v12, %v1614_v58  ;;  %v1195_v17 = vpop.eup %1194  ;;  %v351_v22 = vsel %vm205_vm0, %v343_v15, 0.0  ;;  %1212 = vtanh.f32 %v1000_v1 }
 0x11c   :  { %v215_v14 = vsel %vm205_vm0, %v200_v11, 0.0  ;;  %207 = vadd.xlane.f32.xlu0 %v206_v13  ;;  %v1197_v18 = vpop.eup %1196  ;;  %v345_v23 = vmul.f32 %v1195_v17, %v1614_v58 }
 0x11d   :  { %216 = vadd.xlane.f32.xlu1 %v215_v14  ;;  %v1199_v19 = vpop.eup %1198  ;;  %v360_v20 = vsel %vm205_vm0, %v346_v16, 0.0  ;;  %v199_v24 = vmul.f32 %v1197_v18, %v1614_v58 }
 0x11e   :  { %v1201_v21 = vpop.eup %1200  ;;  %v201_v25 = vmul.f32 %v1199_v19, %v1614_v58  ;;  %v357_v51 = vsel %vm205_vm0, %v345_v23, 0.0 }
 0x11f   :  { %v1203_v48 = vpop.eup %1202  ;;  %v202_v49 = vmul.f32 %v1201_v21, %v1614_v58  ;;  %v212_v52 = vsel %vm205_vm0, %v199_v24, 0.0 }
 0x120   :  { %352 = vadd.xlane.f32.xlu0 %v351_v22  ;;  %v1205_v50 = vpop.eup %1204  ;;  %v218_v53 = vsel %vm205_vm0, %v201_v25, 0.0  ;;  %v347_v54 = vmul.f32 %v1203_v48, %v1614_v58 }
 0x121   :  { %361 = vadd.xlane.f32.xlu1 %v360_v20  ;;  %v221_v56 = vsel %vm205_vm0, %v202_v49, 0.0  ;;  %v348_v57 = vmul.f32 %v1205_v50, %v1614_v58 }
 0x122   :  { %v1207_v55 = vpop.eup %1206  ;;  %v363_v61 = vsel %vm205_vm0, %v347_v54, 0.0 }
 0x123   :  { %v1209_v59 = vpop.eup %1208  ;;  %v203_v62 = vmul.f32 %v1207_v55, %v1614_v58  ;;  %v366_v2 = vsel %vm205_vm0, %v348_v57, 0.0 }
 0x124   :  { %358 = vadd.xlane.f32.xlu0 %v357_v51  ;;  %v1211_v63 = vpop.eup %1210  ;;  %v204_v3 = vmul.f32 %v1209_v59, %v1614_v58 }
 0x125   :  { %213 = vadd.xlane.f32.xlu1 %v212_v52  ;;  %v1213_v4 = vpop.eup %1212  ;;  %v224_v6 = vsel %vm205_vm0, %v203_v62, 0.0  ;;  %v349_v8 = vmul.f32 %v1211_v63, %v1614_v58 }
 0x126   :  { %v227_v9 = vsel %vm205_vm0, %v204_v3, 0.0  ;;  %v350_v11 = vmul.f32 %v1213_v4, %v1614_v58 }
 0x127   :  { %v369_v14 = vsel %vm205_vm0, %v349_v8, 0.0 }
 0x128   :  { %219 = vadd.xlane.f32.xlu0 %v218_v53  ;;  %v372_v15 = vsel %vm205_vm0, %v350_v11, 0.0 }
 0x129   :  { %222 = vadd.xlane.f32.xlu1 %v221_v56  ;;  %v1035_v60 = vpop.f32.mrb[8].mxu0 }
 0x12a   :  { %1214 = vtanh.f32 %v1035_v60  ;;  %v441_v0 = vpop.f32.mrb[9].mxu0  ;;  %v1041_v1 = vpop.f32.mrb[8].mxu1 }
 0x12b   :  { %1216 = vtanh.f32 %v441_v0  ;;  %v461_v5 = vpop.f32.mrb[9].mxu1 }
 0x12c   :  { %1218 = vtanh.f32 %v1041_v1  ;;  %364 = vadd.xlane.f32.xlu0 %v363_v61 }
 0x12d   :  { %367 = vadd.xlane.f32.xlu1 %v366_v2  ;;  %1220 = vtanh.f32 %v461_v5  ;;  %v1038_v7 = vpop.f32.mrb[10].mxu0 }
 0x12e   :  { %1222 = vtanh.f32 %v1038_v7  ;;  %v451_v10 = vpop.f32.mrb[11].mxu0  ;;  %v1044_v12 = vpop.f32.mrb[10].mxu1 }
 0x12f   :  { %1224 = vtanh.f32 %v451_v10  ;;  %v471_v13 = vpop.f32.mrb[11].mxu1 }
 0x130   :  { %225 = vadd.xlane.f32.xlu0 %v224_v6  ;;  %1226 = vtanh.f32 %v1044_v12 }
 0x131   :  { %228 = vadd.xlane.f32.xlu1 %v227_v9  ;;  %1228 = vtanh.f32 %v471_v13 }
 0x134   :  { %v1215_v16 = vpop.eup %1214  ;;  %370 = vadd.xlane.f32.xlu0 %v369_v14 }
 0x135   :  { %v1217_v17 = vpop.eup %1216  ;;  %373 = vadd.xlane.f32.xlu1 %v372_v15  ;;  %v489_v18 = vmul.f32 %v1215_v16, %v1614_v58 }
 0x136   :  { %v1219_v19 = vpop.eup %1218  ;;  %v488_v20 = vmul.f32 %v1217_v17, %v1614_v58 }
 0x137   :  { %v1221_v21 = vpop.eup %1220  ;;  %v499_v22 = vsel %vm205_vm0, %v489_v18, 0.0  ;;  %v493_v23 = vmul.f32 %v1219_v19, %v1614_v58 }
 0x138   :  { %v1223_v24 = vpop.eup %1222  ;;  %v496_v25 = vsel %vm205_vm0, %v488_v20, 0.0  ;;  %v492_v48 = vmul.f32 %v1221_v21, %v1614_v58 }
 0x139   :  { %v1225_v49 = vpop.eup %1224  ;;  %500 = vadd.xlane.f32.xlu1 %v499_v22  ;;  %497 = vadd.xlane.f32.xlu0 %v496_v25  ;;  %v511_v51 = vsel %vm205_vm0, %v493_v23, 0.0  ;;  %v491_v53 = vmul.f32 %v1223_v24, %v1614_v58 }
 0x13a   :  { %v1227_v50 = vpop.eup %1226  ;;  %v508_v52 = vsel %vm205_vm0, %v492_v48, 0.0  ;;  %v490_v54 = vmul.f32 %v1225_v49, %v1614_v58 }
 0x13b   :  { %v1229_v55 = vpop.eup %1228  ;;  %v505_v56 = vsel %vm205_vm0, %v491_v53, 0.0  ;;  %v495_v59 = vmul.f32 %v1227_v50, %v1614_v58 }
 0x13c   :  { %v502_v57 = vsel %vm205_vm0, %v490_v54, 0.0  ;;  %v494_v60 = vmul.f32 %v1229_v55, %v1614_v58 }
 0x13d   :  { %512 = vadd.xlane.f32.xlu1 %v511_v51  ;;  %509 = vadd.xlane.f32.xlu0 %v508_v52  ;;  %v517_v61 = vsel %vm205_vm0, %v495_v59, 0.0 }
 0x13e   :  { %v514_v62 = vsel %vm205_vm0, %v494_v60, 0.0 }
 0x141   :  { %506 = vadd.xlane.f32.xlu1 %v505_v56  ;;  %503 = vadd.xlane.f32.xlu0 %v502_v57 }
 0x145   :  { %518 = vadd.xlane.f32.xlu1 %v517_v61  ;;  %515 = vadd.xlane.f32.xlu0 %v514_v62 }
 0x1a5   :  { %v211_v63 = vpop.xlane.xlu0 %210 }
 0x1a6   :  { %v356_v0 = vpop.xlane.xlu1 %355 }
 0x1a7   :  { %v522_v14 = vsel %vm520_vm1, %v211_v63, %v356_v0 }
 0x1a9   :  { %v208_v1 = vpop.xlane.xlu0 %207 }
 0x1aa   :  { %v217_v2 = vpop.xlane.xlu1 %216 }
 0x1ad   :  { %v353_v3 = vpop.xlane.xlu0 %352 }
 0x1ae   :  { %v362_v4 = vpop.xlane.xlu1 %361  ;;  %v521_v15 = vsel %vm520_vm1, %v208_v1, %v353_v3 }
 0x1af   :  { %v524_v54 = vsel %vm520_vm1, %v217_v2, %v362_v4 }
 0x1b1   :  { %v359_v5 = vpop.xlane.xlu0 %358 }
 0x1b2   :  { %v214_v6 = vpop.xlane.xlu1 %213 }
 0x1b3   :  { %v523_v55 = vsel %vm520_vm1, %v214_v6, %v359_v5 }
 0x1b5   :  { %v220_v7 = vpop.xlane.xlu0 %219 }
 0x1b6   :  { %v223_v8 = vpop.xlane.xlu1 %222 }
 0x1b9   :  { %v365_v9 = vpop.xlane.xlu0 %364 }
 0x1ba   :  { %v368_v58 = vpop.xlane.xlu1 %367  ;;  %v525_v23 = vsel %vm520_vm1, %v220_v7, %v365_v9 }
 0x1bb   :  { %v526_v22 = vsel %vm520_vm1, %v223_v8, %v368_v58 }
 0x1bd   :  { %v226_v10 = vpop.xlane.xlu0 %225 }
 0x1be   :  { %v229_v11 = vpop.xlane.xlu1 %228 }
 0x1c1   :  { %v371_v12 = vpop.xlane.xlu0 %370 }
 0x1c2   :  { %v374_v13 = vpop.xlane.xlu1 %373  ;;  %v527_v2 = vsel %vm520_vm1, %v226_v10, %v371_v12 }
 0x1c3   :  { %v528_v1 = vsel %vm520_vm1, %v229_v11, %v374_v13 }
 0x1c6   :  { %v501_v16 = vpop.xlane.xlu1 %500  ;;  %v498_v17 = vpop.xlane.xlu0 %497 }
 0x1c7   :  { %v531_v18 = vsel %vm529_vm2, %v522_v14, %v501_v16  ;;  %v530_v19 = vsel %vm529_vm2, %v521_v15, %v498_v17 }
 0x1c8   :  { %v539_v20 = vadd.f32 1e-06, %v531_v18  ;;  %v538_v21 = vadd.f32 1e-06, %v530_v19 }
 0x1ca   :  { %v513_v24 = vpop.xlane.xlu1 %512  ;;  %v550_v25 = vsel %vm546_vm3, %v539_v20, -inf  ;;  %v510_v48 = vpop.xlane.xlu0 %509  ;;  %v547_v49 = vsel %vm546_vm3, %v538_v21, -inf }
 0x1cb   :  { %v535_v50 = vsel %vm529_vm2, %v526_v22, %v513_v24  ;;  %551 = vmax.xlane.f32.xlu1 %v550_v25  ;;  %v534_v51 = vsel %vm529_vm2, %v525_v23, %v510_v48  ;;  %548 = vmax.xlane.f32.xlu0 %v547_v49 }
 0x1cc   :  { %v543_v52 = vadd.f32 1e-06, %v535_v50  ;;  %v542_v53 = vadd.f32 1e-06, %v534_v51 }
 0x1ce   :  { %v507_v56 = vpop.xlane.xlu1 %506  ;;  %v562_v57 = vsel %vm546_vm3, %v543_v52, -inf  ;;  %v504_v59 = vpop.xlane.xlu0 %503  ;;  %v559_v60 = vsel %vm546_vm3, %v542_v53, -inf }
 0x1cf   :  { %v533_v61 = vsel %vm529_vm2, %v524_v54, %v507_v56  ;;  %563 = vmax.xlane.f32.xlu1 %v562_v57  ;;  %v532_v62 = vsel %vm529_vm2, %v523_v55, %v504_v59  ;;  %560 = vmax.xlane.f32.xlu0 %v559_v60 }
 0x1d0   :  { %v541_v63 = vadd.f32 1e-06, %v533_v61  ;;  %v540_v0 = vadd.f32 1e-06, %v532_v62 }
 0x1d2   :  { %v519_v3 = vpop.xlane.xlu1 %518  ;;  %v556_v4 = vsel %vm546_vm3, %v541_v63, -inf  ;;  %v516_v5 = vpop.xlane.xlu0 %515  ;;  %v553_v6 = vsel %vm546_vm3, %v540_v0, -inf }
 0x1d3   :  { %v537_v7 = vsel %vm529_vm2, %v528_v1, %v519_v3  ;;  %557 = vmax.xlane.f32.xlu1 %v556_v4  ;;  %v536_v8 = vsel %vm529_vm2, %v527_v2, %v516_v5  ;;  %554 = vmax.xlane.f32.xlu0 %v553_v6 }
 0x1d4   :  { %v545_v9 = vadd.f32 1e-06, %v537_v7  ;;  %v544_v58 = vadd.f32 1e-06, %v536_v8 }
 0x1d6   :  { %v568_v14 = vsel %vm546_vm3, %v545_v9, -inf  ;;  %v565_v11 = vsel %vm546_vm3, %v544_v58, -inf }
 0x1d7   :  { %569 = vmax.xlane.f32.xlu1 %v568_v14  ;;  %566 = vmax.xlane.f32.xlu0 %v565_v11  ;;  %v1315_v14 = vmov 1   ;;  %v1316_v11 = vmov 0  }
 0x1d8   :  { %1165 = vset.pattern.permute.xlu0 %v1315_v14  ;;  %1164 = vset.pattern.permute.xlu1 %v1316_v11 }
 0x258   :  { %v552_v10 = vpop.xlane.xlu1 %551  ;;  %v549_v12 = vpop.xlane.xlu0 %548 }
 0x259   :  { %v572_v13 = vsub.f32 %v539_v20, %v552_v10  ;;  %v571_v15 = vsub.f32 %v538_v21, %v549_v12 }
 0x25b   :  { %v581_v16 = vmul.f32 1.442695, %v572_v13  ;;  %v579_v17 = vmul.f32 1.442695, %v571_v15 }
 0x25c   :  { %v564_v18 = vpop.xlane.xlu1 %563  ;;  %v561_v19 = vpop.xlane.xlu0 %560 }
 0x25d   :  { %1230 = vpow2.f32 %v581_v16  ;;  %v576_v22 = vsub.f32 %v543_v52, %v564_v18  ;;  %v575_v23 = vsub.f32 %v542_v53, %v561_v19 }
 0x25e   :  { %1232 = vpow2.f32 %v579_v17 }
 0x25f   :  { %v589_v24 = vmul.f32 1.442695, %v576_v22  ;;  %v587_v25 = vmul.f32 1.442695, %v575_v23 }
 0x260   :  { %v558_v48 = vpop.xlane.xlu1 %557  ;;  %v555_v49 = vpop.xlane.xlu0 %554 }
 0x261   :  { %1234 = vpow2.f32 %v589_v24  ;;  %v574_v50 = vsub.f32 %v541_v63, %v558_v48  ;;  %v573_v51 = vsub.f32 %v540_v0, %v555_v49 }
 0x262   :  { %1236 = vpow2.f32 %v587_v25 }
 0x263   :  { %v585_v54 = vmul.f32 1.442695, %v574_v50  ;;  %v583_v55 = vmul.f32 1.442695, %v573_v51 }
 0x264   :  { %v570_v20 = vpop.xlane.xlu1 %569  ;;  %v567_v21 = vpop.xlane.xlu0 %566 }
 0x265   :  { %1238 = vpow2.f32 %v585_v54  ;;  %v578_v56 = vsub.f32 %v545_v9, %v570_v20  ;;  %v577_v57 = vsub.f32 %v544_v58, %v567_v21 }
 0x266   :  { %1240 = vpow2.f32 %v583_v55 }
 0x267   :  { %v1231_v59 = vpop.eup %1230  ;;  %v593_v52 = vmul.f32 1.442695, %v578_v56  ;;  %v591_v53 = vmul.f32 1.442695, %v577_v57 }
 0x268   :  { %v1233_v60 = vpop.eup %1232  ;;  %v598_v61 = vsel %vm546_vm3, %v1231_v59, 0.0 }
 0x269   :  { %1242 = vpow2.f32 %v593_v52  ;;  %599 = vadd.xlane.f32.xlu1 %v598_v61  ;;  %v595_v62 = vsel %vm546_vm3, %v1233_v60, 0.0 }
 0x26a   :  { %1244 = vpow2.f32 %v591_v53  ;;  %596 = vadd.xlane.f32.xlu0 %v595_v62 }
 0x26b   :  { %v1690_v63 = vpop.eup %1234 }
 0x26c   :  { %v1692_v0 = vpop.eup %1236  ;;  %v610_v1 = vsel %vm546_vm3, %v1690_v63, 0.0 }
 0x26d   :  { %611 = vadd.xlane.f32.xlu1 %v610_v1  ;;  %v607_v2 = vsel %vm546_vm3, %v1692_v0, 0.0 }
 0x26e   :  { %608 = vadd.xlane.f32.xlu0 %v607_v2 }
 0x26f   :  { %v1698_v3 = vpop.eup %1238 }
 0x270   :  { %v1700_v4 = vpop.eup %1240  ;;  %v604_v5 = vsel %vm546_vm3, %v1698_v3, 0.0 }
 0x271   :  { %605 = vadd.xlane.f32.xlu1 %v604_v5  ;;  %v601_v6 = vsel %vm546_vm3, %v1700_v4, 0.0 }
 0x272   :  { %602 = vadd.xlane.f32.xlu0 %v601_v6 }
 0x273   :  { %v1706_v7 = vpop.eup %1242 }
 0x274   :  { %v1708_v8 = vpop.eup %1244  ;;  %v616_v9 = vsel %vm546_vm3, %v1706_v7, 0.0 }
 0x275   :  { %617 = vadd.xlane.f32.xlu1 %v616_v9  ;;  %v613_v58 = vsel %vm546_vm3, %v1708_v8, 0.0 }
 0x276   :  { %614 = vadd.xlane.f32.xlu0 %v613_v58 }
 0x2f6   :  { %v600_v10 = vpop.xlane.xlu1 %599 }
 0x2f7   :  { %1246 = vrcp.f32 %v600_v10  ;;  %v597_v12 = vpop.xlane.xlu0 %596 }
 0x2f8   :  { %1248 = vrcp.f32 %v597_v12 }
 0x2fa   :  { %v612_v13 = vpop.xlane.xlu1 %611 }
 0x2fb   :  { %1250 = vrcp.f32 %v612_v13  ;;  %v609_v15 = vpop.xlane.xlu0 %608 }
 0x2fc   :  { %1252 = vrcp.f32 %v609_v15 }
 0x2fe   :  { %v606_v16 = vpop.xlane.xlu1 %605 }
 0x2ff   :  { %1254 = vrcp.f32 %v606_v16  ;;  %v603_v17 = vpop.xlane.xlu0 %602 }
 0x300   :  { %1256 = vrcp.f32 %v603_v17 }
 0x301   :  { %v1247_v18 = vpop.eup %1246 }
 0x302   :  { %v1249_v19 = vpop.eup %1248  ;;  %v628_v22 = vmul.f32 %v1247_v18, %v600_v10  ;;  %v618_v23 = vpop.xlane.xlu1 %617 }
 0x303   :  { %v627_v24 = vmul.f32 %v1249_v19, %v597_v12  ;;  %1258 = vrcp.f32 %v618_v23  ;;  %v615_v25 = vpop.xlane.xlu0 %614 }
 0x304   :  { %v636_v48 = vsub.f32 2.0, %v628_v22  ;;  %1260 = vrcp.f32 %v615_v25 }
 0x305   :  { %v1251_v49 = vpop.eup %1250  ;;  %v635_v50 = vsub.f32 2.0, %v627_v24 }
 0x306   :  { %v1253_v51 = vpop.eup %1252  ;;  %v644_v54 = vmul.f32 %v1247_v18, %v636_v48  ;;  %v632_v55 = vmul.f32 %v1251_v49, %v612_v13 }
 0x307   :  { %v643_v20 = vmul.f32 %v1249_v19, %v635_v50  ;;  %v631_v21 = vmul.f32 %v1253_v51, %v609_v15 }
 0x308   :  { %v652_v56 = vmul.f32 %v1231_v59, %v644_v54  ;;  %v640_v57 = vsub.f32 2.0, %v632_v55 }
 0x309   :  { %v1255_v52 = vpop.eup %1254  ;;  %v651_v53 = vmul.f32 %v1233_v60, %v643_v20  ;;  %v639_v61 = vsub.f32 2.0, %v631_v21 }
 0x30a   :  { %v1257_v62 = vpop.eup %1256  ;;  %660 = vst.msk [vmem:[%s1813_s6 + $0x8] sm:$0xff] %vm546_vm3, %v652_v56  ;;  %v648_v1 = vmul.f32 %v1251_v49, %v640_v57  ;;  %v630_v2 = vmul.f32 %v1255_v52, %v606_v16  ;;  %674 = vperm.xlu1 %1164, %v652_v56   ;;  %720 = vperm.xlu0 %1165, %v652_v56   ;;  %v1317_v16 = vmov 2  }
 0x30b   :  { %659 = vst.msk [vmem:[%s1813_s6] sm:$0xff] %vm546_vm3, %v651_v53  ;;  %v647_v59 = vmul.f32 %v1253_v51, %v639_v61  ;;  %v629_v5 = vmul.f32 %v1257_v62, %v603_v17 }
 0x30c   :  { %v656_v60 = vmul.f32 %v1690_v63, %v648_v1  ;;  %v638_v6 = vsub.f32 2.0, %v630_v2 }
 0x30d   :  { %v1259_v9 = vpop.eup %1258  ;;  %v655_v58 = vmul.f32 %v1692_v0, %v647_v59  ;;  %v637_v10 = vsub.f32 2.0, %v629_v5 }
 0x30e   :  { %v1261_v12 = vpop.eup %1260  ;;  %664 = vst.msk [vmem:[%s1813_s6 + $0x28] sm:$0xff] %vm546_vm3, %v656_v60  ;;  %v646_v13 = vmul.f32 %v1255_v52, %v638_v6  ;;  %v634_v15 = vmul.f32 %v1259_v9, %v618_v23  ;;  %694 = vperm.xlu1 %1164, %v656_v60   ;;  %1168 = vset.pattern.permute.xlu0 %v1317_v16 }
 0x30f   :  { %663 = vst.msk [vmem:[%s1813_s6 + $0x20] sm:$0xff] %vm546_vm3, %v655_v58  ;;  %v645_v63 = vmul.f32 %v1257_v62, %v637_v10  ;;  %v633_v17 = vmul.f32 %v1261_v12, %v615_v25  ;;  %784 = vperm.xlu0 %1168, %v656_v60  }
 0x310   :  { %v654_v0 = vmul.f32 %v1698_v3, %v646_v13  ;;  %v642_v18 = vsub.f32 2.0, %v634_v15 }
 0x311   :  { %v653_v19 = vmul.f32 %v1700_v4, %v645_v63  ;;  %v641_v22 = vsub.f32 2.0, %v633_v17 }
 0x312   :  { %662 = vst.msk [vmem:[%s1813_s6 + $0x18] sm:$0xff] %vm546_vm3, %v654_v0  ;;  %v650_v23 = vmul.f32 %v1259_v9, %v642_v18  ;;  %1166 = vset.pattern.permute.xlu1 %v1315_v14 }
 0x313   :  { %661 = vst.msk [vmem:[%s1813_s6 + $0x10] sm:$0xff] %vm546_vm3, %v653_v19  ;;  %v649_v24 = vmul.f32 %v1261_v12, %v641_v22  ;;  %736 = vperm.xlu1 %1166, %v656_v60   ;;  %1169 = vset.pattern.permute.xlu0 %v1316_v11 }
 0x314   :  { %v658_v3 = vmul.f32 %v1706_v7, %v650_v23  ;;  %669 = vperm.xlu0 %1169, %v651_v53  }
 0x315   :  { %v657_v4 = vmul.f32 %v1708_v8, %v649_v24 }
 0x316   :  { %666 = vst.msk [vmem:[%s1813_s6 + $0x38] sm:$0xff] %vm546_vm3, %v658_v3 }
 0x317   :  { %665 = vst.msk [vmem:[%s1813_s6 + $0x30] sm:$0xff] %vm546_vm3, %v657_v4  ;;  %1167 = vset.pattern.permute.xlu1 %v1317_v16 }
 0x318   :  { %768 = vperm.xlu1 %1167, %v652_v56   ;;  %1172 = vset.pattern.permute.xlu0 %v1315_v14 }
 0x319   :  { %732 = vperm.xlu0 %1172, %v655_v58  }
 0x31c   :  { %1170 = vset.pattern.permute.xlu1 %v1316_v11 }
 0x31d   :  { %1173 = vset.pattern.permute.xlu0 %v1317_v16  ;;  %689 = vperm.xlu1 %1170, %v655_v58  }
 0x31e   :  { %764 = vperm.xlu0 %1173, %v651_v53  }
 0x321   :  { %1171 = vset.pattern.permute.xlu1 %v1315_v14 }
 0x322   :  { %776 = vperm.xlu0 %1173, %v654_v0   ;;  %716 = vperm.xlu1 %1171, %v651_v53  }
 0x326   :  { %1179 = vset.pattern.permute.xlu0 %v1315_v14  ;;  %1174 = vset.pattern.permute.xlu1 %v1317_v16 }
 0x327   :  { %780 = vperm.xlu1 %1174, %v655_v58   ;;  %740 = vperm.xlu0 %1179, %v657_v4  }
 0x32b   :  { %1175 = vset.pattern.permute.xlu1 %v1316_v11  ;;  %1181 = vset.pattern.permute.xlu0 %v1317_v16 }
 0x32c   :  { %684 = vperm.xlu1 %1175, %v654_v0   ;;  %792 = vperm.xlu0 %1181, %v658_v3  }
 0x330   :  { %704 = vperm.xlu1 %1175, %v658_v3  }
 0x334   :  { %1176 = vset.pattern.permute.xlu1 %v1315_v14 }
 0x335   :  { %728 = vperm.xlu1 %1176, %v654_v0  }
 0x339   :  { %744 = vperm.xlu1 %1176, %v658_v3  }
 0x33d   :  { %1177 = vset.pattern.permute.xlu1 %v1316_v11 }
 0x33e   :  { %679 = vperm.xlu1 %1177, %v653_v19  }
 0x342   :  { %699 = vperm.xlu1 %1177, %v657_v4  }
 0x346   :  { %1178 = vset.pattern.permute.xlu1 %v1315_v14 }
 0x347   :  { %724 = vperm.xlu1 %1178, %v653_v19  }
 0x34b   :  { %1180 = vset.pattern.permute.xlu1 %v1317_v16 }
 0x34c   :  { %772 = vperm.xlu1 %1180, %v653_v19  }
 0x350   :  { %788 = vperm.xlu1 %1180, %v657_v4  }
 0x389   :  { %v675_v7 = vpop.permute.xlu1 %674  ;;  %v721_v8 = vpop.permute.xlu0 %720 }
 0x38a   :  { %v708_v54 = vmul.f32 %v675_v7, %v1474_v26  ;;  %v748_v11 = vmul.f32 %v721_v8, %v1479_v27  ;;  %v1262_v26 = vld [vmem:[%s1807_s0] sm:$0xff]  ;;  %s1318_s0 = smov [#allocation5]  }
 0x38c   :  { %v756_v57 = vadd.f32 %v748_v11, %v708_v54 }
 0x38d   :  { %v695_v25 = vpop.permute.xlu1 %694 }
 0x38e   :  { %v785_v48 = vpop.permute.xlu0 %784  ;;  %v712_v50 = vmul.f32 %v695_v25, %v1528_v34 }
 0x38f   :  { %v800_v55 = vmul.f32 %v785_v48, %v1595_v43  ;;  %v1263_v43 = vld [vmem:[%s1808_s1] sm:$0xff]  ;;  %s824_s1 = sshll.u32 %s1318_s0, 4  ;;  %s825_s1 = int_to_ptr.vmem [resolvable:$true] %s824_s1 }
 0x390   :  { %s1286_s3 = scalar_lea.vmem %s825_s1, 1024  ;;  %p1291_p9 = scmp.lt.s32.totalorder %s825_s1, %s825_s1 }
 0x391   :  { %p1287_p8 = scmp.ne.s32.totalorder %s825_s1, %s1286_s3  ;;  %p1292_p10 = scmp.lt.s32.totalorder %s1286_s3, %s1286_s3 }
 0x392   :  { %v737_v49 = vpop.permute.xlu1 %736 }
 0x393   :  { %v752_v51 = vmul.f32 %v737_v49, %v1533_v35  ;;  %v670_v20 = vpop.permute.xlu0 %669  ;;  %p1293_p11 = por %p1292_p10, %p1291_p9 }
 0x394   :  { %v707_v27 = vmul.f32 %v1262_v26, %v670_v20 }
 0x395   :  { %v760_v14 = vadd.f32 %v752_v51, %v712_v50  ;;  %p1294_p12 = pnand %p1293_p11, %p1287_p8 }
 0x397   :  { %v808_v21 = vadd.f32 %v800_v55, %v760_v14  ;;  %v769_v56 = vpop.permute.xlu1 %768 }
 0x398   :  { %v796_v52 = vmul.f32 %v769_v56, %v1592_v42  ;;  %v733_v61 = vpop.permute.xlu0 %732 }
 0x399   :  { %816 = vst [vmem:[#allocation5 + $0x28] sm:$0xff] %v808_v21  ;;  %v751_v5 = vmul.f32 %v733_v61, %v1521_v33 }
 0x39a   :  { %v804_v53 = vadd.f32 %v796_v52, %v756_v57 }
 0x39c   :  { %812 = vst [vmem:[#allocation5 + $0x8] sm:$0xff] %v804_v53  ;;  %v690_v34 = vpop.permute.xlu1 %689 }
 0x39d   :  { %v765_v62 = vpop.permute.xlu0 %764  ;;  %v711_v2 = vmul.f32 %v690_v34, %v1512_v32 }
 0x39e   :  { %v795_v42 = vmul.f32 %v765_v62, %v1565_v40 }
 0x39f   :  { %v759_v9 = vadd.f32 %v751_v5, %v711_v2 }
 0x3a1   :  { %v717_v35 = vpop.permute.xlu1 %716  ;;  %v777_v13 = vpop.permute.xlu0 %776 }
 0x3a2   :  { %v747_v1 = vmul.f32 %v1263_v43, %v717_v35  ;;  %v798_v17 = vmul.f32 %v777_v13, %v1604_v46 }
 0x3a4   :  { %v755_v59 = vadd.f32 %v747_v1, %v707_v27 }
 0x3a6   :  { %v803_v60 = vadd.f32 %v795_v42, %v755_v59  ;;  %v781_v6 = vpop.permute.xlu1 %780  ;;  %v741_v16 = vpop.permute.xlu0 %740 }
 0x3a7   :  { %v799_v58 = vmul.f32 %v781_v6, %v1571_v41 }
 0x3a8   :  { %811 = vst [vmem:[#allocation5] sm:$0xff] %v803_v60 }
 0x3a9   :  { %v807_v10 = vadd.f32 %v799_v58, %v759_v9 }
 0x3ab   :  { %815 = vst [vmem:[#allocation5 + $0x20] sm:$0xff] %v807_v10  ;;  %v685_v12 = vpop.permute.xlu1 %684  ;;  %v793_v0 = vpop.permute.xlu0 %792 }
 0x3ac   :  { %v710_v32 = vmul.f32 %v685_v12, %v1500_v30  ;;  %v802_v23 = vmul.f32 %v793_v0, %v1607_v47 }
 0x3af   :  { %v705_v15 = vpop.permute.xlu1 %704 }
 0x3b0   :  { %v714_v19 = vmul.f32 %v705_v15, %v1556_v38 }
 0x3b4   :  { %v729_v63 = vpop.permute.xlu1 %728 }
 0x3b5   :  { %v750_v40 = vmul.f32 %v729_v63, %v1505_v31 }
 0x3b7   :  { %v758_v33 = vadd.f32 %v750_v40, %v710_v32 }
 0x3b8   :  { %v745_v18 = vpop.permute.xlu1 %744 }
 0x3b9   :  { %v806_v41 = vadd.f32 %v798_v17, %v758_v33  ;;  %v754_v22 = vmul.f32 %v745_v18, %v1561_v39  ;;  %v753_v39 = vmul.f32 %v741_v16, %v1549_v37 }
 0x3bb   :  { %814 = vst [vmem:[#allocation5 + $0x18] sm:$0xff] %v806_v41  ;;  %v762_v24 = vadd.f32 %v754_v22, %v714_v19 }
 0x3bd   :  { %v810_v3 = vadd.f32 %v802_v23, %v762_v24  ;;  %v680_v4 = vpop.permute.xlu1 %679 }
 0x3be   :  { %v709_v46 = vmul.f32 %v680_v4, %v1485_v28 }
 0x3bf   :  { %818 = vst [vmem:[#allocation5 + $0x38] sm:$0xff] %v810_v3 }
 0x3c1   :  { %v700_v30 = vpop.permute.xlu1 %699 }
 0x3c2   :  { %v713_v25 = vmul.f32 %v700_v30, %v1540_v36 }
 0x3c4   :  { %v761_v50 = vadd.f32 %v753_v39, %v713_v25 }
 0x3c6   :  { %v725_v7 = vpop.permute.xlu1 %724 }
 0x3c7   :  { %v749_v31 = vmul.f32 %v725_v7, %v1493_v29 }
 0x3c9   :  { %v757_v38 = vadd.f32 %v749_v31, %v709_v46 }
 0x3cb   :  { %v773_v8 = vpop.permute.xlu1 %772 }
 0x3cc   :  { %v797_v48 = vmul.f32 %v773_v8, %v1597_v44 }
 0x3ce   :  { %v805_v47 = vadd.f32 %v797_v48, %v757_v38 }
 0x3cf   :  { %v789_v49 = vpop.permute.xlu1 %788 }
 0x3d0   :  { %813 = vst [vmem:[#allocation5 + $0x10] sm:$0xff] %v805_v47  ;;  %v801_v51 = vmul.f32 %v789_v49, %v1599_v45 }
 0x3d2   :  { %v809_v54 = vadd.f32 %v801_v51, %v761_v50 }
 0x3d4   :  { %817 = vst [vmem:[#allocation5 + $0x30] sm:$0xff] %v809_v54 }
 0x3d5   :  { %1297 = shalt.err (!%p1294_p12)
}
 0x3d6   :  { %s1298_s25 = scalar_lea.hbm %s1812_s5, 1024 }
 0x3d7   :  { %p1299_p13 = scmp.ne.s32.totalorder %s1812_s5, %s1298_s25  ;;  %p1302_p0 = scmp.lt.u32.totalorder %s1298_s25, %s1812_s5 }
 0x3d9   :  { %p1304_p1 = pnand %p1302_p0, %p1299_p13 }
 0x3db   :  { %1307 = shalt.err (!%p1304_p1)
}
 0x3dc   :  { %830 = dma.vmem_to_hbm [thread:$0]  %s825_s1, 1024, %s1812_s5, [#allocation4], %s1313_s7, %s1313_s7, %s1314_s8  }
 0x3dd   :  { %1310 = dma.done.wait [#allocation4], 1024  }
 0x3de   :  { %1311 = vsyncadd [#allocation4], 4294966272 }
 0x3df   :  { %838 = vsyncpa [#allocation3], 1 }
 0x3e0   :  { %839 = vsyncpa [#allocation4], 1 }

</bundles_post_ra>
